<compile_context>
chip_gen: v7x
topology: tpu7x:2x2x1
jax: 0.10.0
libtpu: 0.0.40
codegen_flags: <defaults>
</compile_context>

<pallas_src>
import jax
import jax.numpy as jnp
from jax.experimental import pallas as pl
from jax.experimental.pallas import tpu as pltpu


def _affine_kernel(scale_ref, bias_ref, x_ref, o_ref):
    # scale/bias live in SMEM as (1,) f32 scalars; read once per grid step and let the
    # scalar->vector broadcast stay hoisted (no per-iteration broadcast_in_dim).
    s = scale_ref[0]
    b = bias_ref[0]
    # f32 scalar * narrow tile promotes to f32; cast back explicitly on the store.
    o_ref[...] = (x_ref[...] * s + b).astype(o_ref.dtype)


def _ceil_div(a, b):
    return -(-a // b)


def _round_up(a, m):
    return _ceil_div(a, m) * m


def _default_block_bytes():
    # v5-class (and older/unknown) chips: 16 MiB scoped-VMEM default and slower HBM;
    # 2 MiB blocks already sit on the mem-bound plateau and 4 buffers fit comfortably.
    # v6e/v7x: 32 MiB scoped default and much faster HBM; 4 MiB blocks amortize the
    # ~0.35 us per-grid-step overhead (4 buffers = 16 MiB, still well within limits).
    try:
        kind = jax.devices()[0].device_kind.lower()
    except Exception:
        return 2 * 1024 * 1024
    if ("v6" in kind) or ("v7" in kind):
        return 4 * 1024 * 1024
    return 2 * 1024 * 1024


def _choose_layout(n, itemsize, target_block_bytes):
    """Pick (lane, rows, block_rows) for a flat element count n.  Never pads."""
    # Widest lane axis (multiple of 128, <= 4096) that divides n exactly.
    lane = None
    for cand in (4096, 2048, 1024, 512, 256, 128):
        if n % cand == 0:
            lane = cand
            break
    if lane is None:
        # Awkward (non-128-aligned) count: use the largest divisor of n (<= 4096) as a
        # full-extent lane dim.  BlockSpec allows a last dim equal to the full array
        # dim, so this still needs no pad / unpad copy passes (single read + write).
        # Lanes < 128 take masked stores, but only rare odd shapes ever hit this.
        lane = 1
        for cand in range(min(n, 4096), 0, -1):
            if n % cand == 0:
                lane = cand
                break
    rows = n // lane

    if rows <= 8:
        # Tiny input: one full-extent block (second-minor dim == full array dim).
        return lane, rows, rows

    # ~target_block_bytes per buffer, rows a multiple of 8.
    by_bytes = max(8, (target_block_bytes // (lane * itemsize)) // 8 * 8)
    # Keep >= 4 grid steps when there is enough data so each v7x TensorCore gets >= 2
    # blocks and its input DMA / compute / output DMA actually pipeline.
    quarter = max(8, (rows // 4) // 8 * 8)
    block_rows = min(by_bytes, quarter)

    # Prefer an even number of grid steps so v7x's two cores get equal work.
    grid = _ceil_div(rows, block_rows)
    if grid > 1 and grid % 2 == 1:
        for tgt in (grid + 1, grid - 1):
            if tgt < 2:
                continue
            cand = max(8, _round_up(_ceil_div(rows, tgt), 8))
            if _ceil_div(rows, cand) % 2 == 0:
                block_rows = cand
                break
    return lane, rows, block_rows


def learnable_affine_block(x, scale, bias, *, target_block_bytes=None, donate_x=False):
    """Apply y = scale * x + bias elementwise via a Pallas TPU kernel.

    x: any-shape array (NCHW here). scale, bias: scalar parameters.
    donate_x=True adds input_output_aliases so x's HBM buffer can be reused when the
    caller donates it (same shape/dtype elementwise op).
    """
    orig_shape = x.shape
    orig_dtype = x.dtype
    n = int(x.size)
    itemsize = jnp.dtype(orig_dtype).itemsize
    if target_block_bytes is None:
        target_block_bytes = _default_block_bytes()

    lane, rows, block_rows = _choose_layout(n, itemsize, target_block_bytes)

    # Pure reshape: no padding, no copies.  Partial edge blocks (rows % block_rows != 0)
    # are handled by Pallas' masked edge stores, not by padding.
    x2d = x.reshape(rows, lane)

    scale_arr = jnp.asarray(scale, dtype=jnp.float32).reshape((1,))
    bias_arr = jnp.asarray(bias, dtype=jnp.float32).reshape((1,))

    grid = (_ceil_div(rows, block_rows),)
    out2d = pl.pallas_call(
        _affine_kernel,
        out_shape=jax.ShapeDtypeStruct((rows, lane), orig_dtype),
        grid_spec=pltpu.PrefetchScalarGridSpec(
            num_scalar_prefetch=0,
            grid=grid,
            in_specs=[
                pl.BlockSpec(memory_space=pltpu.SMEM),  # scale, (1,) f32
                pl.BlockSpec(memory_space=pltpu.SMEM),  # bias,  (1,) f32
                pl.BlockSpec((block_rows, lane), lambda i: (i, 0)),  # x tile (lane-dense)
            ],
            out_specs=pl.BlockSpec((block_rows, lane), lambda i: (i, 0)),
        ),
        compiler_params=pltpu.CompilerParams(dimension_semantics=("parallel",)),
        # Pure memory traffic: 2 VALU ops per element, 1 read + 1 write of the array.
        cost_estimate=pl.CostEstimate(
            flops=2 * n, transcendentals=0, bytes_accessed=2 * n * itemsize
        ),
        input_output_aliases=({2: 0} if donate_x else {}),
    )(scale_arr, bias_arr, x2d)

    return out2d.reshape(orig_shape)


if __name__ == "__main__":
    key = jax.random.PRNGKey(0)
    # NCHW input consistent with a conv backbone block: batch=2, channels=4, 16x16 spatial.
    x = jax.random.normal(key, (2, 4, 16, 16), dtype=jnp.float32)

    # Deterministic parameter init matching the module defaults:
    # scale = 1.0, bias = 0.0 (nn.Parameter(torch.tensor(...)))
    scale_value = jnp.float32(1.0)
    bias_value = jnp.float32(0.0)

    y = jax.block_until_ready(learnable_affine_block(x, scale_value, bias_value))
    y_ref = scale_value * x + bias_value
    assert y.shape == x.shape and y.dtype == x.dtype
    assert jnp.allclose(y, y_ref, atol=1e-6, rtol=1e-6)

    # Non-default parameter values.
    y2 = jax.block_until_ready(learnable_affine_block(x, 1.5, -0.25))
    assert jnp.allclose(y2, 1.5 * x - 0.25, atol=1e-6, rtol=1e-6)

    # Awkward (non-128-aligned) shape: exercises the full-extent-lane path (no padding).
    x_odd = jax.random.normal(jax.random.PRNGKey(1), (3, 5, 7, 9), dtype=jnp.float32)
    y3 = jax.block_until_ready(learnable_affine_block(x_odd, 0.75, 2.0))
    assert y3.shape == x_odd.shape
    assert jnp.allclose(y3, 0.75 * x_odd + 2.0, atol=1e-6, rtol=1e-6)

    # bf16 input: verifies the explicit cast on the store.
    x_bf16 = x.astype(jnp.bfloat16)
    y4 = jax.block_until_ready(learnable_affine_block(x_bf16, 1.5, -0.25))
    assert y4.dtype == jnp.bfloat16
    assert jnp.allclose(
        y4.astype(jnp.float32),
        (1.5 * x_bf16.astype(jnp.float32) - 0.25),
        atol=2e-2,
        rtol=2e-2,
    )

    # Larger activation: exercises the multi-step grid, even-step adjustment, and the
    # masked partial edge block (rows % block_rows != 0) without any padding copies.
    x_big = jax.random.normal(jax.random.PRNGKey(2), (2, 32, 56, 56), dtype=jnp.float32)
    y5 = jax.block_until_ready(learnable_affine_block(x_big, 0.5, 1.0))
    assert y5.shape == x_big.shape and y5.dtype == x_big.dtype
    assert jnp.allclose(y5, 0.5 * x_big + 1.0, atol=1e-6, rtol=1e-6)

    print("KERNEL_OK")
</pallas_src>

<mosaic_0001>
module attributes {stable_mosaic.version = 11 : i64} {
  func.func @_affine_kernel(%arg0: i32, %arg1: memref<1xf32, #tpu.memory_space<smem>>, %arg2: memref<1xf32, #tpu.memory_space<smem>>, %arg3: memref<1x2048xf32, #tpu.memory_space<vmem>>, %arg4: memref<1x2048xf32, #tpu.memory_space<vmem>>) attributes {dimension_semantics = [#tpu.dimension_semantics<parallel>], iteration_bounds = array<i64: 1>, scalar_prefetch = 0 : i64, scratch_operands = 0 : i64, tpu.core_type = #tpu.core_type<tc>, window_params = [{transform_indices = @transform_0, window_bounds = array<i64: 1>}, {transform_indices = @transform_1, window_bounds = array<i64: 1>}, {transform_indices = @transform_2, window_bounds = array<i64: 1, 2048>}, {transform_indices = @transform_3, window_bounds = array<i64: 1, 2048>}]} {
    %c0 = arith.constant 0 : index
    %0 = memref.load %arg1[%c0] : memref<1xf32, #tpu.memory_space<smem>>
    %c0_0 = arith.constant 0 : index
    %1 = memref.load %arg2[%c0_0] : memref<1xf32, #tpu.memory_space<smem>>
    %c0_1 = arith.constant 0 : index
    %c0_2 = arith.constant 0 : index
    %2 = vector.load %arg3[%c0_1, %c0_2] : memref<1x2048xf32, #tpu.memory_space<vmem>>, vector<1x2048xf32>
    %3 = vector.broadcast %0 : f32 to vector<1x2048xf32>
    %4 = arith.mulf %2, %3 : vector<1x2048xf32>
    %5 = vector.broadcast %1 : f32 to vector<1x2048xf32>
    %6 = arith.addf %4, %5 : vector<1x2048xf32>
    %c0_3 = arith.constant 0 : index
    %c0_4 = arith.constant 0 : index
    %7 = vector.load %arg4[%c0_3, %c0_4] : memref<1x2048xf32, #tpu.memory_space<vmem>>, vector<1x2048xf32>
    tpu.vector_store %arg4[%c0_3, %c0_4], %6 {strides = array<i32>} : memref<1x2048xf32, #tpu.memory_space<vmem>>, vector<1x2048xf32>,
    return
  }
  func.func @transform_0(%arg0: i32) -> i32 {
    %c0_i32 = arith.constant 0 : i32
    %c0_i32_0 = arith.constant 0 : i32
    return %c0_i32 : i32
  }
  func.func @transform_1(%arg0: i32) -> i32 {
    %c0_i32 = arith.constant 0 : i32
    %c0_i32_0 = arith.constant 0 : i32
    return %c0_i32 : i32
  }
  func.func @transform_2(%arg0: i32) -> (i32, i32) {
    %c0_i32 = arith.constant 0 : i32
    %c0_i32_0 = arith.constant 0 : i32
    return %arg0, %c0_i32 : i32, i32
  }
  func.func @transform_3(%arg0: i32) -> (i32, i32) {
    %c0_i32 = arith.constant 0 : i32
    %c0_i32_0 = arith.constant 0 : i32
    return %arg0, %c0_i32 : i32, i32
  }
}

</mosaic_0001>

<bundles_post_ra>
// kernel: tpu_custom_call.1
= control target key start
LH: loop header
LB: loop body
LE: loop exit
PB: predicated region body
PF: predicated region fallthrough
CT: control target
= control target key end

     0   :  { %10 = vsyncpa [#allocation5], 0  ;;  %s158_s0 = inlined_call_operand.<no memory space> [shape: f32[1], index: 0, kind: input, shape index: {}]   ;;  %s159_s1 = inlined_call_operand.<no memory space> [shape: f32[1], index: 1, kind: input, shape index: {}]   ;;  %s160_s2 = inlined_call_operand.hbm [shape: f32[1,2048], index: 2, kind: input, shape index: {}]   ;;  %s161_s3 = inlined_call_operand.hbm [shape: f32[1,2048], index: 3, kind: output, shape index: {}]  }
   0x1   :  { %11 = vsyncpa [#allocation6], 0  ;;  %s106_s12 = smov [#allocation4]   ;;  %s58_s16 = scalar_lea.hbm %s160_s2, 256 }
   0x2   :  { %s22_s13 = sshll.u32 %s106_s12, 4  ;;  %p59_p0 = scmp.ne.s32.totalorder %s160_s2, %s58_s16  ;;  %s23_s13 = int_to_ptr.vmem [resolvable:$true] %s22_s13 }
   0x3   :  { %p62_p1 = scmp.lt.u32.totalorder %s58_s16, %s160_s2 }
   0x5   :  { %p64_p2 = pnand %p62_p1, %p59_p0 }
   0x7   :  { %67 = shalt.err (!%p64_p2)
}
   0x8   :  { %s68_s21 = scalar_lea.vmem %s23_s13, 256  ;;  %p73_p4 = scmp.lt.s32.totalorder %s23_s13, %s23_s13 }
   0x9   :  { %p69_p3 = scmp.ne.s32.totalorder %s23_s13, %s68_s21  ;;  %p74_p5 = scmp.lt.s32.totalorder %s68_s21, %s68_s21 }
   0xb   :  { %p75_p6 = por %p74_p5, %p73_p4 }
   0xd   :  { %p76_p7 = pnand %p75_p6, %p69_p3 }
   0xf   :  { %79 = shalt.err (!%p76_p7)
}
  0x10   :  { %25 = dma.hbm_to_vmem [thread:$0]  %s160_s2, 256, %s23_s13, [#allocation5]  }
  0x11   :  { %102 = dma.done.wait [#allocation5], 256  }
  0x12   :  { %103 = vsyncadd [#allocation5], 4294967040  ;;  %v33_v0 = vstv %s158_s0  ;;  %v31_v1 = vld [vmem:[#allocation4] sm:$0xff]  ;;  %v36_v2 = vstv %s159_s1  ;;  %v32_v3 = vld [vmem:[#allocation4 + $0x8] sm:$0xff]  ;;  %s107_s28 = smov [#allocation7]  }
  0x13   :  { %s47_s29 = sshll.u32 %s107_s28, 4  ;;  %v34_v4 = vmul.f32 %v33_v0, %v31_v1  ;;  %v35_v5 = vmul.f32 %v33_v0, %v32_v3  ;;  %s48_s29 = int_to_ptr.vmem [resolvable:$true] %s47_s29 }
  0x14   :  { %s80_s2 = scalar_lea.vmem %s48_s29, 256  ;;  %p85_p9 = scmp.lt.s32.totalorder %s48_s29, %s48_s29 }
  0x15   :  { %v37_v6 = vadd.f32 %v36_v2, %v34_v4  ;;  %v38_v7 = vadd.f32 %v36_v2, %v35_v5  ;;  %p81_p8 = scmp.ne.s32.totalorder %s48_s29, %s80_s2  ;;  %p86_p10 = scmp.lt.s32.totalorder %s80_s2, %s80_s2 }
  0x17   :  { %39 = vst [vmem:[#allocation7] sm:$0xff] %v37_v6  ;;  %40 = vst [vmem:[#allocation7 + $0x8] sm:$0xff] %v38_v7  ;;  %p87_p11 = por %p86_p10, %p85_p9 }
  0x19   :  { %p88_p12 = pnand %p87_p11, %p81_p8 }
  0x1b   :  { %91 = shalt.err (!%p88_p12)
}
  0x1c   :  { %s92_s1 = scalar_lea.hbm %s161_s3, 256 }
  0x1d   :  { %p93_p13 = scmp.ne.s32.totalorder %s161_s3, %s92_s1  ;;  %p96_p0 = scmp.lt.u32.totalorder %s92_s1, %s161_s3 }
  0x1f   :  { %p98_p1 = pnand %p96_p0, %p93_p13 }
  0x21   :  { %101 = shalt.err (!%p98_p1)
}
  0x22   :  { %50 = dma.vmem_to_hbm [thread:$0]  %s48_s29, 256, %s161_s3, [#allocation6]  }
  0x23   :  { %104 = dma.done.wait [#allocation6], 256  }
  0x24   :  { %105 = vsyncadd [#allocation6], 4294967040 }
  0x25   :  { %54 = vsyncpa [#allocation5], 1 }
  0x26   :  { %55 = vsyncpa [#allocation6], 1 }

</bundles_post_ra>
